<compile_context>
chip_gen: v7x
topology: tpu7x:2x2x1
jax: 0.10.0
libtpu: 0.0.40
codegen_flags: <defaults>
</compile_context>

<pallas_src>
import functools

import jax
import jax.numpy as jnp
from jax.experimental import pallas as pl
from jax.experimental.pallas import tpu as pltpu


def _gsl_kernel(s1_ref, s2_ref, adj_full_ref, out_ref, *, tm, n):
    f32 = jnp.float32

    adj_full = adj_full_ref[...]                           # (BB, N, N) resident, low-prec
    if tm == n:
        adj_rows = adj_full                                # whole graph in one row tile
    else:
        r = pl.program_id(1)
        row0 = pl.multiple_of(r * tm, tm)                  # aligned to packed sublanes
        adj_rows = adj_full_ref[:, pl.ds(row0, tm), :]     # (BB, TM, N) sliced in VMEM
    acc_dtype = jnp.int32 if jnp.issubdtype(adj_full.dtype, jnp.integer) else f32

    # adj2[rows, :] = adj[rows, :] @ adj  -- the dominant MXU op.  Low-precision 0/1
    # operands with i32/f32 accumulation keep the !=0 pattern bit-exact.
    adj2 = jnp.einsum("gik,gkj->gij", adj_rows, adj_full,
                      preferred_element_type=acc_dtype)    # (BB, TM, N)
    mask = adj2 != 0

    # score[i, j] = s1_i + s2_j (projections folded & precomputed in the wrapper).
    score = s1_ref[...] + s2_ref[...]                      # (BB,TM,1)+(BB,1,N) -> (BB,TM,N)

    # nn.ELU(alpha=1) followed by exp(-.).  Direct exp(score) in the negative branch
    # (no separable-exp overflow risk); 2 N^2 EUP ops, hidden under the HBM-bound DMA.
    t = jnp.exp(score)
    elu = jnp.where(score > 0.0, score, t - 1.0)
    e = jnp.where(mask, jnp.exp(-elu), 0.0)
    # TODO(synk): nn.Dropout on edge_e treated as eval-mode identity (inference semantics).

    rowsum = jnp.sum(e, axis=-1, keepdims=True) + 1e-25    # e_rowsum + 1e-25
    out_ref[...] = (e * pl.reciprocal(rowsum, approx=False)).astype(out_ref.dtype)


def _tpu_defaults():
    """Per-generation defaults: adjacency MXU dtype, VMEM budget/limit, megacore-ness."""
    kind = ""
    try:
        kind = jax.devices()[0].device_kind.lower()
    except Exception:
        pass
    is_v7 = ("v7" in kind) or ("tpu7" in kind)
    is_v6 = "v6" in kind
    is_v5e = ("v5e" in kind) or ("v5 lite" in kind) or ("v5lite" in kind)
    is_v5p = ("v5" in kind) and not is_v5e
    is_v4 = "v4" in kind

    phys = 64 << 20 if (is_v7 or not kind) else 128 << 20  # VMEM per TensorCore
    try:
        phys = min(phys, int(pltpu.get_tpu_info().vmem_capacity_bytes))
    except Exception:
        pass

    if is_v7:
        adj_dtype = getattr(jnp, "float8_e4m3fn", jnp.bfloat16)   # fp8 MXU (no int path)
    elif is_v6 or is_v5e:
        adj_dtype = jnp.int8                                      # native int8 MXU
    else:
        adj_dtype = jnp.bfloat16                                  # safe cross-gen default

    if phys >= (100 << 20):            # v4 / v5e / v5p / v6e: 128 MiB physical
        budget, vmem_cap = 90 << 20, 100 << 20
    else:                              # v7x (or unknown): 64 MiB physical
        budget, vmem_cap = 40 << 20, 48 << 20

    multi_core = is_v7 or is_v4 or is_v5p          # 2 TensorCores per chip
    return adj_dtype, budget, vmem_cap, multi_core


def _choose_tiling(B, N, adj_bytes, out_bytes, budget_bytes, prefer_multi_batch_blocks,
                   row_align):
    """Pick (BB graphs / step, TM output rows / step) under a per-generation VMEM budget."""

    def pad(v, m):
        return -(-v // m) * m

    def est(bb, tm):
        dbl = 2                                              # BlockSpec double-buffering
        # TODO(synk): pipeline_mode=pl.Buffered(1) on the resident adj/s2 blocks would
        # drop their second buffer (most valuable under v7x's 64 MiB VMEM).
        v = dbl * bb * pad(N, 8) * pad(N, 128) * adj_bytes   # resident adj[b]
        v += dbl * bb * pad(tm, 8) * pad(N, 128) * out_bytes # output row tile
        v += dbl * bb * pad(tm, 8) * 128 * 4                 # s1 row tile (lane padded)
        v += dbl * bb * 8 * pad(N, 128) * 4                  # s2 resident (sublane padded)
        v += 7 * bb * pad(tm, 8) * pad(N, 128) * 4           # live f32/i32 intermediates
        return v

    # Row tiles must divide N (no partial tiles) and be aligned to the adjacency dtype's
    # packed-sublane quantum (so the in-kernel pl.ds row slice is aligned), or equal N.
    tm_cands = [d for d in range(row_align, min(N, 512) + 1, row_align) if N % d == 0]
    if N <= 512 or not tm_cands:
        tm_cands.append(N)
    tm_cands = sorted(set(tm_cands), reverse=True)

    # Small graphs: several graphs per grid step amortize the ~0.35us/step overhead.
    # TODO(synk): for N << 128 a lane-dense packing (k = 128//N graphs block-diagonal
    # along the lane axis) would lift VPU/EUP/store lane utilization up to ~8x.
    bb_cap = max(1, 2048 // max(N, 1))
    bb_cands = [d for d in range(min(B, bb_cap), 0, -1) if B % d == 0]
    if prefer_multi_batch_blocks and B >= 2:
        # Keep >= 2 batch blocks so a 2-TC chip shards disjoint graphs instead of the r
        # axis (which would duplicate the resident adjacency fetch on both cores).
        pref = [d for d in bb_cands if B // d >= 2]
        bb_cands = pref + [d for d in bb_cands if d not in pref]

    for bb in bb_cands:
        for tm in tm_cands:
            if est(bb, tm) <= budget_bytes:
                return bb, tm, est(bb, tm)

    # TODO(synk): k-tile the stationary adj[b] RHS (third 'arbitrary' grid axis + adj2
    # accumulator) to lift the N ceiling, especially under v7x's 64 MiB VMEM.
    bb, tm = 1, min(tm_cands)
    return bb, tm, est(bb, tm)


def gsl_layer(x, adj, W, a, *, adj_compute_dtype=None, out_dtype=jnp.float32):
    """x: (B, N, F) f32, adj: (B, N, N), W: (F, H), a: (1, 2H)  ->  pij: (B, N, N).

    adj_compute_dtype: MXU dtype for the adj@adj product.  None auto-selects int8
      (v5e/v6e), float8_e4m3fn (v7x) or bf16 -- all exact for 0/1 adjacency.  Pass
      jnp.float32 explicitly for weighted (non-binary) adjacencies.
    out_dtype: jnp.bfloat16 halves the dominant (B, N, N) output HBM stream and is
      strongly recommended when downstream tolerates it; default stays f32 to match
      the PyTorch forward exactly.
    """
    B, N, F = x.shape
    H = W.shape[1]

    auto_dtype, budget, vmem_cap, multi_core = _tpu_defaults()
    if adj_compute_dtype is None:
        # Low-precision adjacency only pays in the HBM-bound large-N regime.
        adj_compute_dtype = auto_dtype if N >= 128 else jnp.bfloat16

    # Folded score projection: (x@W)@a1 == x@(W@a1).  Computing the two O(B*N) score
    # vectors here (negligible next to the O(B*N^3) adj@adj) removes both x HBM streams
    # and all non-adjacency MXU work from the kernel.
    wa1 = W @ a[0, :H]
    wa2 = W @ a[0, H:]
    s1 = jnp.einsum("bnf,f->bn", x, wa1)[:, :, None].astype(jnp.float32)   # (B, N, 1)
    s2 = jnp.einsum("bnf,f->bn", x, wa2)[:, None, :].astype(jnp.float32)   # (B, 1, N)

    out_bytes = jnp.dtype(out_dtype).itemsize

    def run(adj_dtype):
        adj_bytes = jnp.dtype(adj_dtype).itemsize
        row_align = max(8, 32 // adj_bytes)          # packed-sublane quantum of adj dtype
        BB, TM, vmem_est = _choose_tiling(B, N, adj_bytes, out_bytes, budget,
                                          multi_core, row_align)
        G, R = B // BB, N // TM

        # TODO(synk): fuse this cast into the pallas_call operand (CompilerParams
        # allow_input_fusion) or pre-cast/reuse the adjacency across layers so single-use
        # adjacency does not pay a standalone HBM pass.
        adj_c = adj if adj.dtype == jnp.dtype(adj_dtype) else adj.astype(adj_dtype)

        vmem_limit = int(min(max(int(vmem_est * 1.5), 32 << 20), vmem_cap))
        kernel = functools.partial(_gsl_kernel, tm=TM, n=N)

        return pl.pallas_call(
            kernel,
            out_shape=jax.ShapeDtypeStruct((B, N, N), out_dtype),
            grid_spec=pltpu.PrefetchScalarGridSpec(
                num_scalar_prefetch=0,
                grid=(G, R),
                in_specs=[
                    pl.BlockSpec((BB, TM, 1), lambda g, r: (g, r, 0)),  # s1 rows
                    pl.BlockSpec((BB, 1, N), lambda g, r: (g, 0, 0)),   # s2 (resident)
                    pl.BlockSpec((BB, N, N), lambda g, r: (g, 0, 0)),   # adj[b] (resident)
                ],
                out_specs=pl.BlockSpec((BB, TM, N), lambda g, r: (g, r, 0)),
            ),
            compiler_params=pltpu.CompilerParams(
                dimension_semantics=("parallel", "parallel"),
                vmem_limit_bytes=vmem_limit,
            ),
        )(s1, s2, adj_c)

    try:
        return run(adj_compute_dtype)
    except Exception:
        # int8 / fp8 MXU paths are generation-dependent; bf16 with f32 accumulation is
        # exact for 0/1 adjacency on every generation -- retry before giving up.
        if jnp.dtype(adj_compute_dtype) in (jnp.dtype(jnp.bfloat16), jnp.dtype(jnp.float32)):
            raise
        return run(jnp.bfloat16)


def _reference(x, adj, W, a):
    """Pure-JAX dense reference in the original PyTorch op order."""
    H = W.shape[1]

    def one(xb, adjb):
        adj2 = adjb @ adjb
        mask = adj2 != 0.0
        h = xb @ W
        s = h @ a[:, :H].T + (h @ a[:, H:].T).T
        elu = jnp.where(s > 0.0, s, jnp.exp(s) - 1.0)
        e = jnp.where(mask, jnp.exp(-elu), 0.0)
        rs = jnp.sum(e, axis=1, keepdims=True) + 1e-25
        return e / rs

    return jax.vmap(one)(x, adj)


def _make_inputs(key, B, N, nfeat, nhid, density):
    k1, k2, k3, k4 = jax.random.split(key, 4)
    x = jax.random.normal(k1, (B, N, nfeat), dtype=jnp.float32)
    adj = (jax.random.uniform(k2, (B, N, N)) < density).astype(jnp.float32)
    # deterministic xavier_normal_ init (gain=1.414), matching the nn.Parameter shapes
    gain = 1.414
    W = (gain * (2.0 / (nfeat + nhid)) ** 0.5) * jax.random.normal(
        k3, (nfeat, nhid), dtype=jnp.float32)
    a = (gain * (2.0 / (1 + 2 * nhid)) ** 0.5) * jax.random.normal(
        k4, (1, 2 * nhid), dtype=jnp.float32)
    return x, adj, W, a


if __name__ == "__main__":
    key = jax.random.PRNGKey(0)
    k_small, k_big = jax.random.split(key)

    # 1) Spec-sized case: B=2 graphs of N=16 nodes, nfeat=nhid=32.
    x, adj, W, a = _make_inputs(k_small, B=2, N=16, nfeat=32, nhid=32, density=0.3)
    out = jax.block_until_ready(gsl_layer(x, adj, W, a))
    ref = jax.block_until_ready(_reference(x, adj, W, a))
    assert out.shape == (2, 16, 16) and out.dtype == jnp.float32
    assert jnp.allclose(out, ref, rtol=1e-4, atol=1e-5), "small-case mismatch vs reference"

    # 2) Larger case exercising the row-tiled grid and low-precision adjacency path.
    x, adj, W, a = _make_inputs(k_big, B=2, N=1024, nfeat=64, nhid=64, density=0.02)
    out = jax.block_until_ready(gsl_layer(x, adj, W, a))
    ref = jax.block_until_ready(_reference(x, adj, W, a))
    assert out.shape == (2, 1024, 1024)
    assert jnp.allclose(out, ref, rtol=1e-4, atol=1e-5), "tiled-case mismatch vs reference"

    print("KERNEL_OK")
</pallas_src>

<mosaic_0001>
module attributes {stable_mosaic.version = 11 : i64} {
  func.func @_gsl_kernel(%arg0: i32, %arg1: i32, %arg2: memref<2x16x1xf32, #tpu.memory_space<vmem>>, %arg3: memref<2x1x16xf32, #tpu.memory_space<vmem>>, %arg4: memref<2x16x16xbf16, #tpu.memory_space<vmem>>, %arg5: memref<2x16x16xf32, #tpu.memory_space<vmem>>) attributes {dimension_semantics = [#tpu.dimension_semantics<parallel>, #tpu.dimension_semantics<parallel>], iteration_bounds = array<i64: 1, 1>, scalar_prefetch = 0 : i64, scratch_operands = 0 : i64, tpu.core_type = #tpu.core_type<tc>, window_params = [{transform_indices = @transform_0, window_bounds = array<i64: 2, 16, 1>}, {transform_indices = @transform_1, window_bounds = array<i64: 2, 1, 16>}, {transform_indices = @transform_2, window_bounds = array<i64: 2, 16, 16>}, {transform_indices = @transform_3, window_bounds = array<i64: 2, 16, 16>}]} {
    %c0 = arith.constant 0 : index
    %c0_0 = arith.constant 0 : index
    %c0_1 = arith.constant 0 : index
    %0 = vector.load %arg4[%c0, %c0_0, %c0_1] : memref<2x16x16xbf16, #tpu.memory_space<vmem>>, vector<2x16x16xbf16>
    "tpu.trace_start"() <{level = 10 : i32, message = "gik,gkj->gij"}> : () -> ()
    %cst = arith.constant dense<0.000000e+00> : vector<2x16x16xf32>
    %1 = tpu.matmul %0, %0, %cst {dimension_numbers = #tpu.dot_dimension_numbers<[2], [1], [1], [2], [0, 0, 0, 1, 1, 2], [0], [0]>} : vector<2x16x16xbf16>, vector<2x16x16xbf16>, vector<2x16x16xf32> -> vector<2x16x16xf32>
    %cst_2 = arith.constant 0.000000e+00 : f32
    "tpu.trace_stop"() : () -> ()
    %2 = vector.broadcast %cst_2 : f32 to vector<2x16x16xf32>
    %3 = arith.cmpf one, %1, %2 : vector<2x16x16xf32>
    %c0_3 = arith.constant 0 : index
    %c0_4 = arith.constant 0 : index
    %c0_5 = arith.constant 0 : index
    %4 = vector.load %arg2[%c0_3, %c0_4, %c0_5] : memref<2x16x1xf32, #tpu.memory_space<vmem>>, vector<2x16x1xf32>
    %c0_6 = arith.constant 0 : index
    %c0_7 = arith.constant 0 : index
    %c0_8 = arith.constant 0 : index
    %5 = vector.load %arg3[%c0_6, %c0_7, %c0_8] : memref<2x1x16xf32, #tpu.memory_space<vmem>>, vector<2x1x16xf32>
    %6 = vector.broadcast %4 : vector<2x16x1xf32> to vector<2x16x16xf32>
    %7 = vector.broadcast %5 : vector<2x1x16xf32> to vector<2x16x16xf32>
    %8 = arith.addf %6, %7 : vector<2x16x16xf32>
    %9 = math.exp %8 : vector<2x16x16xf32>
    %cst_9 = arith.constant 0.000000e+00 : f32
    %10 = vector.broadcast %cst_9 : f32 to vector<2x16x16xf32>
    %11 = arith.cmpf ogt, %8, %10 : vector<2x16x16xf32>
    %cst_10 = arith.constant 1.000000e+00 : f32
    %12 = vector.broadcast %cst_10 : f32 to vector<2x16x16xf32>
    %13 = arith.subf %9, %12 : vector<2x16x16xf32>
    %14 = arith.select %11, %8, %13 : vector<2x16x16xi1>, vector<2x16x16xf32>
    %cst_11 = arith.constant 0.000000e+00 : f32
    %15 = vector.broadcast %cst_11 : f32 to vector<2x16x16xf32>
    %16 = arith.subf %15, %14 : vector<2x16x16xf32>
    %17 = math.exp %16 : vector<2x16x16xf32>
    %cst_12 = arith.constant 0.000000e+00 : f32
    %18 = vector.broadcast %cst_12 : f32 to vector<2x16x16xf32>
    %19 = arith.select %3, %17, %18 : vector<2x16x16xi1>, vector<2x16x16xf32>
    %cst_13 = arith.constant dense<0.000000e+00> : vector<2x16xf32>
    %20 = vector.multi_reduction <add>, %19, %cst_13 [2] : vector<2x16x16xf32> to vector<2x16xf32>
    %21 = vector.shape_cast %20 : vector<2x16xf32> to vector<2x16x1xf32>
    %cst_14 = arith.constant 1.000000e-25 : f32
    %22 = vector.broadcast %cst_14 : f32 to vector<2x16x1xf32>
    %23 = arith.addf %21, %22 : vector<2x16x1xf32>
    %24 = tpu.reciprocal %23 : vector<2x16x1xf32> -> vector<2x16x1xf32>
    %25 = vector.broadcast %24 : vector<2x16x1xf32> to vector<2x16x16xf32>
    %26 = arith.mulf %19, %25 : vector<2x16x16xf32>
    %c0_15 = arith.constant 0 : index
    %c0_16 = arith.constant 0 : index
    %c0_17 = arith.constant 0 : index
    %27 = vector.load %arg5[%c0_15, %c0_16, %c0_17] : memref<2x16x16xf32, #tpu.memory_space<vmem>>, vector<2x16x16xf32>
    tpu.vector_store %arg5[%c0_15, %c0_16, %c0_17], %26 {strides = array<i32>} : memref<2x16x16xf32, #tpu.memory_space<vmem>>, vector<2x16x16xf32>,
    return
  }
  func.func @transform_0(%arg0: i32, %arg1: i32) -> (i32, i32, i32) {
    %c0_i32 = arith.constant 0 : i32
    %c0_i32_0 = arith.constant 0 : i32
    return %arg0, %arg1, %c0_i32 : i32, i32, i32
  }
  func.func @transform_1(%arg0: i32, %arg1: i32) -> (i32, i32, i32) {
    %c0_i32 = arith.constant 0 : i32
    %c0_i32_0 = arith.constant 0 : i32
    %c0_i32_1 = arith.constant 0 : i32
    return %arg0, %c0_i32, %c0_i32_0 : i32, i32, i32
  }
  func.func @transform_2(%arg0: i32, %arg1: i32) -> (i32, i32, i32) {
    %c0_i32 = arith.constant 0 : i32
    %c0_i32_0 = arith.constant 0 : i32
    %c0_i32_1 = arith.constant 0 : i32
    return %arg0, %c0_i32, %c0_i32_0 : i32, i32, i32
  }
  func.func @transform_3(%arg0: i32, %arg1: i32) -> (i32, i32, i32) {
    %c0_i32 = arith.constant 0 : i32
    %c0_i32_0 = arith.constant 0 : i32
    return %arg0, %arg1, %c0_i32 : i32, i32, i32
  }
}

</mosaic_0001>

<bundles_post_ra>
// kernel: tpu_custom_call.1
= control target key start
LH: loop header
LB: loop body
LE: loop exit
PB: predicated region body
PF: predicated region fallthrough
CT: control target
= control target key end

     0   :  { %v331_v1 = vmov 0.0   ;;  %vm332_vm0 = vmmov 0   ;;  %vm26_vm1 = vcmask 130048   ;;  %s403_s0 = inlined_call_operand.vmem [shape: f32[2,16,1], index: 0, kind: input, shape index: {}]   ;;  %s404_s1 = inlined_call_operand.vmem [shape: f32[2,1,16], index: 1, kind: input, shape index: {}]   ;;  %s405_s2 = inlined_call_operand.vmem [shape: bf16[2,16,16], index: 2, kind: input, shape index: {}]   ;;  %s406_s3 = inlined_call_operand.hbm [shape: f32[2,16,16], index: 3, kind: output, shape index: {}]  }
   0x1   :  { %v281_v0 = vld [vmem:[%s405_s2] sm:$0xff]   ;;  %261 = vmatprep.subr.bf16.mxu0 %v331_v1  ;;  %267 = vmatprep.subr.bf16.mxu1 %v331_v1  ;;  %v282_v2 = vld [vmem:[%s405_s2 + $0x8] sm:$0xff]   ;;  %v127_v4 = vld [vmem:[%s403_s0 + $0x10] sm:$0xff] }
   0x2   :  { %262 = vmatpush3.bf16.msra.mxu0 %v281_v0  ;;  %263 = vmatprep.mubr.msk.bf16.mxu0 %vm332_vm0, %v331_v1  ;;  %v125_v3 = vld [vmem:[%s403_s0] sm:$0xff] }
   0x3   :  { %268 = vmatpush3.bf16.msra.mxu1 %v282_v2  ;;  %269 = vmatprep.mubr.msk.bf16.mxu1 %vm332_vm0, %v331_v1 }
   0x4   :  { %8 = vsyncpa [#allocation3], 0  ;;  %v333_v5 = vmov 0   ;;  %v126_v6 = vld [vmem:[%s403_s0 + $0x8] sm:$0xff]  ;;  %v128_v7 = vld [vmem:[%s403_s0 + $0x18] sm:$0xff]  ;;  %s334_s0 = smov [#allocation2]  }
   0x5   :  { %279 = vset.pattern.permute.xlu0 %v333_v5  ;;  %280 = vset.pattern.permute.xlu1 %v333_v5  ;;  %v251_v9 = vld [vmem:[%s404_s1] ss:$0 sm:$0xff]  ;;  %v252_v11 = vld [vmem:[%s404_s1 + $0x1] ss:$0 sm:$0xff]  ;;  %s236_s1 = sshll.u32 %s334_s0, 4  ;;  %s237_s1 = int_to_ptr.vmem [resolvable:$true] %s236_s1 }
   0x6   :  { %264 = vmatmul.mubr.msk.bf16.vlgmr.msra.gmra.mrb[0].mxu0 %vm26_vm1, %v281_v0  ;;  %133 = vperm.xlu0 %279, %v125_v3   ;;  %s307_s27 = scalar_lea.vmem %s237_s1, 512  ;;  %p312_p1 = scmp.lt.s32.totalorder %s237_s1, %s237_s1 }
   0x7   :  { %270 = vmatmul.mubr.msk.bf16.vlgmr.msra.gmra.mrb[0].mxu1 %vm26_vm1, %v282_v2  ;;  %143 = vperm.xlu1 %280, %v127_v4   ;;  %p308_p0 = scmp.ne.s32.totalorder %s237_s1, %s307_s27  ;;  %p313_p2 = scmp.lt.s32.totalorder %s307_s27, %s307_s27 }
   0x9   :  { %p314_p3 = por %p313_p2, %p312_p1 }
   0xa   :  { %138 = vperm.xlu0 %279, %v126_v6  }
   0xb   :  { %148 = vperm.xlu1 %280, %v128_v7   ;;  %p315_p4 = pnand %p314_p3, %p308_p0 }
  0x85   :  { %v134_v8 = vpop.permute.xlu0 %133 }
  0x86   :  { %v144_v10 = vpop.permute.xlu1 %143  ;;  %v163_v13 = vadd.f32 %v251_v9, %v134_v8 }
  0x87   :  { %v165_v14 = vadd.f32 %v252_v11, %v144_v10 }
  0x88   :  { %v167_v17 = vmul.f32 1.442695, %v163_v13  ;;  %vm175_vm2 = vcmp.gt.f32.partialorder %v163_v13, 0.0 }
  0x89   :  { %v139_v12 = vpop.permute.xlu0 %138  ;;  %v171_v18 = vmul.f32 1.442695, %v165_v14  ;;  %vm177_vm3 = vcmp.gt.f32.partialorder %v165_v14, 0.0 }
  0x8a   :  { %v164_v15 = vadd.f32 %v251_v9, %v139_v12  ;;  %v149_v16 = vpop.permute.xlu1 %148  ;;  %283 = vpow2.f32 %v167_v17 }
  0x8b   :  { %v166_v20 = vadd.f32 %v252_v11, %v149_v16  ;;  %285 = vpow2.f32 %v171_v18 }
  0x8c   :  { %v169_v19 = vmul.f32 1.442695, %v164_v15  ;;  %vm176_vm4 = vcmp.gt.f32.partialorder %v164_v15, 0.0 }
  0x8d   :  { %v173_v21 = vmul.f32 1.442695, %v166_v20  ;;  %vm178_vm5 = vcmp.gt.f32.partialorder %v166_v20, 0.0 }
  0x8e   :  { %287 = vpow2.f32 %v169_v19 }
  0x8f   :  { %289 = vpow2.f32 %v173_v21 }
  0x94   :  { %v284_v22 = vpop.eup %283 }
  0x95   :  { %v286_v23 = vpop.eup %285  ;;  %v253_v25 = vadd.f32 -1.0, %v284_v22 }
  0x96   :  { %v255_v26 = vadd.f32 -1.0, %v286_v23 }
  0x97   :  { %v183_v29 = vsel %vm175_vm2, %v163_v13, %v253_v25 }
  0x98   :  { %v288_v24 = vpop.eup %287  ;;  %v185_v30 = vsel %vm177_vm3, %v165_v14, %v255_v26  ;;  %v187_v33 = vsub.f32 0.0, %v183_v29 }
  0x99   :  { %v254_v27 = vadd.f32 -1.0, %v288_v24  ;;  %v290_v28 = vpop.eup %289  ;;  %v189_v34 = vsub.f32 0.0, %v185_v30 }
  0x9a   :  { %v256_v32 = vadd.f32 -1.0, %v290_v28  ;;  %v191_v37 = vmul.f32 1.442695, %v187_v33 }
  0x9b   :  { %v184_v31 = vsel %vm176_vm4, %v164_v15, %v254_v27  ;;  %v195_v38 = vmul.f32 1.442695, %v189_v34 }
  0x9c   :  { %v188_v35 = vsub.f32 0.0, %v184_v31  ;;  %v186_v36 = vsel %vm178_vm5, %v166_v20, %v256_v32  ;;  %291 = vpow2.f32 %v191_v37 }
  0x9d   :  { %v190_v40 = vsub.f32 0.0, %v186_v36  ;;  %293 = vpow2.f32 %v195_v38 }
  0x9e   :  { %v193_v39 = vmul.f32 1.442695, %v188_v35 }
  0x9f   :  { %v197_v41 = vmul.f32 1.442695, %v190_v40 }
  0xa0   :  { %295 = vpow2.f32 %v193_v39 }
  0xa1   :  { %297 = vpow2.f32 %v197_v41 }
  0xa6   :  { %v292_v43 = vpop.eup %291 }
  0xa7   :  { %v294_v46 = vpop.eup %293 }
  0xaa   :  { %v296_v50 = vpop.eup %295 }
  0xab   :  { %v298_v58 = vpop.eup %297 }
  0xd9   :  { %v64_v42 = vpop.f32.mrb[0].mxu0 }
  0xda   :  { %vm121_vm6 = vcmp.ne.f32.partialorder %v64_v42, 0.0  ;;  %v114_v44 = vpop.f32.mrb[0].mxu1  ;;  %v265_v45 = vpop.f32.mrb[1].mxu0 }
  0xdb   :  { %vm123_vm7 = vcmp.ne.f32.partialorder %v114_v44, 0.0  ;;  %v271_v47 = vpop.f32.mrb[1].mxu1  ;;  %v67_v48 = vpop.f32.mrb[2].mxu0  ;;  %v199_v49 = vsel %vm121_vm6, %v292_v43, 0.0 }
  0xdc   :  { %vm122_vm8 = vcmp.ne.f32.partialorder %v67_v48, 0.0  ;;  %v117_v51 = vpop.f32.mrb[2].mxu1  ;;  %v266_v52 = vpop.f32.mrb[3].mxu0  ;;  %v203_v53 = vsel %vm26_vm1, %v199_v49, 0.0  ;;  %v201_v56 = vsel %vm123_vm7, %v294_v46, 0.0 }
  0xdd   :  { %v272_v54 = vpop.f32.mrb[3].mxu1  ;;  %204 = vadd.xlane.f32.xlu0 %v203_v53  ;;  %v200_v55 = vsel %vm122_vm8, %v296_v50, 0.0  ;;  %vm124_vm9 = vcmp.ne.f32.partialorder %v117_v51, 0.0  ;;  %v209_v59 = vsel %vm26_vm1, %v201_v56, 0.0 }
  0xde   :  { %v206_v57 = vsel %vm26_vm1, %v200_v55, 0.0  ;;  %v202_v60 = vsel %vm124_vm9, %v298_v58, 0.0 }
  0xdf   :  { %207 = vadd.xlane.f32.xlu1 %v206_v57  ;;  %v212_v61 = vsel %vm26_vm1, %v202_v60, 0.0 }
  0xe1   :  { %210 = vadd.xlane.f32.xlu0 %v209_v59 }
  0xe5   :  { %213 = vadd.xlane.f32.xlu0 %v212_v61 }
 0x16a   :  { %v205_v62 = vpop.xlane.xlu0 %204 }
 0x16b   :  { %v215_v63 = vadd.f32 1e-25, %v205_v62 }
 0x16c   :  { %v208_v0 = vpop.xlane.xlu1 %207 }
 0x16d   :  { %299 = vrcp.f32 %v215_v63  ;;  %v216_v1 = vadd.f32 1e-25, %v208_v0 }
 0x16e   :  { %v211_v2 = vpop.xlane.xlu0 %210 }
 0x16f   :  { %301 = vrcp.f32 %v216_v1  ;;  %v217_v3 = vadd.f32 1e-25, %v211_v2 }
 0x171   :  { %303 = vrcp.f32 %v217_v3 }
 0x172   :  { %v214_v4 = vpop.xlane.xlu0 %213 }
 0x173   :  { %v218_v5 = vadd.f32 1e-25, %v214_v4 }
 0x175   :  { %305 = vrcp.f32 %v218_v5 }
 0x177   :  { %v300_v6 = vpop.eup %299 }
 0x178   :  { %v223_v7 = vmul.f32 %v300_v6, %v199_v49 }
 0x179   :  { %v302_v8 = vpop.eup %301 }
 0x17a   :  { %227 = vst.msk [vmem:[#allocation2] sm:$0xff] %vm26_vm1, %v223_v7  ;;  %v224_v9 = vmul.f32 %v302_v8, %v200_v55 }
 0x17b   :  { %v304_v10 = vpop.eup %303 }
 0x17c   :  { %228 = vst.msk [vmem:[#allocation2 + $0x8] sm:$0xff] %vm26_vm1, %v224_v9  ;;  %v225_v11 = vmul.f32 %v304_v10, %v201_v56 }
 0x17e   :  { %229 = vst.msk [vmem:[#allocation2 + $0x10] sm:$0xff] %vm26_vm1, %v225_v11 }
 0x17f   :  { %v306_v12 = vpop.eup %305 }
 0x180   :  { %v226_v13 = vmul.f32 %v306_v12, %v202_v60 }
 0x182   :  { %230 = vst.msk [vmem:[#allocation2 + $0x18] sm:$0xff] %vm26_vm1, %v226_v13 }
 0x183   :  { %318 = shalt.err (!%p315_p4)
}
 0x184   :  { %s319_s30 = scalar_lea.hbm %s406_s3, 512 }
 0x185   :  { %p320_p5 = scmp.ne.s32.totalorder %s406_s3, %s319_s30  ;;  %p323_p6 = scmp.lt.u32.totalorder %s319_s30, %s406_s3 }
 0x187   :  { %p325_p7 = pnand %p323_p6, %p320_p5 }
 0x189   :  { %328 = shalt.err (!%p325_p7)
}
 0x18a   :  { %s335_s8 = smov 128   ;;  %s336_s9 = smov 8  }
 0x18b   :  { %242 = dma.vmem_to_hbm [thread:$0]  %s237_s1, 512, %s406_s3, [#allocation3], %s335_s8, %s335_s8, %s336_s9  }
 0x18c   :  { %329 = dma.done.wait [#allocation3], 512  }
 0x18d   :  { %330 = vsyncadd [#allocation3], 4294966784 }
 0x18e   :  { %246 = vsyncpa [#allocation3], 1 }

</bundles_post_ra>
